<compile_context>
chip_gen: v6e
topology: v6e:2x2x1
jax: 0.10.0
libtpu: 0.0.40
codegen_flags: <defaults>
</compile_context>

<pallas_src>
import jax
import jax.numpy as jnp
from jax.experimental import pallas as pl
from jax.experimental.pallas import tpu as pltpu


def _xent_wraw_kernel(x_ref, y_ref, mask_ref, loss_ref, num_ref, den_ref):
    """Fused cross entropy + masked per-position accumulation.

    Block shapes:
      x_ref    : (1, C, TILE_L)  logits (class dim on sublanes, L on lanes)
      y_ref    : (1, 1, TILE_L)  int32 targets
      mask_ref : (1, 1, TILE_L)  f32 mask
      loss_ref : (1, 1, TILE_L)  per-token loss (written every grid step)
      num_ref  : (1, 1, TILE_L)  sum_n loss*mask  (resident across the N axis)
      den_ref  : (1, 1, TILE_L)  sum_n mask       (resident across the N axis)
    """
    n = pl.program_id(1)

    # Stream dtype is whatever the caller passed (e.g. bf16 to halve HBM bytes);
    # all math is done in f32 (v5e has no bf16 VPU/EUP).
    logits = x_ref[0].astype(jnp.float32)                    # (C, TILE_L)
    y = y_ref[0]                                             # (1, TILE_L) int32
    m = mask_ref[0]                                          # (1, TILE_L) f32

    # logsumexp over the class (sublane) axis.
    # TODO(synk): if C ever needs tiling (huge vocab), convert to a streaming
    # running-max logsumexp; the single-shot form is only valid with full-C blocks.
    mx = jnp.max(logits, axis=0, keepdims=True)              # (1, TILE_L)
    lse = jnp.log(jnp.sum(jnp.exp(logits - mx), axis=0, keepdims=True)) + mx

    # Target logit via sublane-iota compare + cross-sublane reduce.
    cls = jax.lax.broadcasted_iota(jnp.int32, logits.shape, 0)
    tgt = jnp.sum(jnp.where(cls == y, logits, 0.0), axis=0, keepdims=True)
    # TODO(synk): no ignore_index handling (out-of-range targets yield loss = lse).

    loss = lse - tgt                                         # (1, TILE_L)
    loss_ref[0] = loss

    @pl.when(n == 0)
    def _():
        num_ref[...] = jnp.zeros_like(num_ref)
        den_ref[...] = jnp.zeros_like(den_ref)

    num_ref[0] += loss * m
    den_ref[0] += m


def _choose_tile_l(L, C, itemsize, per_buffer_budget=6 * 1024 * 1024):
    """Largest lane-dense L tile that divides L and keeps a double-buffered
    (C, TILE_L) logits block within a portable VMEM budget."""
    if L % 128 != 0:
        return L                                   # small/ragged L: one full tile
    limit = max(128, per_buffer_budget // (C * itemsize))
    best, t = 128, 256
    while t <= min(L, limit):
        if L % t == 0:
            best = t
        t += 128
    return best


def seq_weighted_loss(x, y, mask, prev_weight=None, beta=0.999):
    """x: (N, C, L) logits (PyTorch layout), y: (N, L) int targets, mask: (N, L).

    Returns (out, new_weight): out = loss / weight, shape (N, L); new_weight is
    the (L,) running per-position weight buffer (functional state instead of an
    nn buffer)."""
    N, C, L = x.shape
    tile_l = _choose_tile_l(L, C, jnp.dtype(x.dtype).itemsize)
    grid = (L // tile_l, N)

    # Size-1 middle dim keeps the last-two block dims equal to the full array
    # dims / lane-dense multiples (metadata-only reshape, no data movement).
    y3 = y.astype(jnp.int32).reshape(N, 1, L)
    m3 = mask.astype(jnp.float32).reshape(N, 1, L)

    loss3, num3, den3 = pl.pallas_call(
        _xent_wraw_kernel,
        grid=grid,
        in_specs=[
            pl.BlockSpec((1, C, tile_l), lambda l, n: (n, 0, l)),   # logits
            pl.BlockSpec((1, 1, tile_l), lambda l, n: (n, 0, l)),   # targets
            pl.BlockSpec((1, 1, tile_l), lambda l, n: (n, 0, l)),   # mask
        ],
        out_specs=(
            pl.BlockSpec((1, 1, tile_l), lambda l, n: (n, 0, l)),   # per-token loss
            pl.BlockSpec((1, 1, tile_l), lambda l, n: (0, 0, l)),   # num accumulator
            pl.BlockSpec((1, 1, tile_l), lambda l, n: (0, 0, l)),   # den accumulator
        ),
        out_shape=(
            jax.ShapeDtypeStruct((N, 1, L), jnp.float32),
            jax.ShapeDtypeStruct((1, 1, L), jnp.float32),
            jax.ShapeDtypeStruct((1, 1, L), jnp.float32),
        ),
        compiler_params=pltpu.CompilerParams(
            dimension_semantics=("parallel", "arbitrary"),
            vmem_limit_bytes=32 * 1024 * 1024,
        ),
    )(x, y3, m3)

    loss = loss3.reshape(N, L)
    # den == 0 (fully-masked position) divides by zero, same as the PyTorch code.
    w_raw = (num3 / den3).reshape(L)

    # Tiny tail kept in plain jnp (per perf review): median, EMA, final divide.
    # torch.median of an even-length vector returns the LOWER middle element.
    med = jnp.sort(w_raw)[(L - 1) // 2]
    w = w_raw / med

    if prev_weight is None:
        new_weight = w                      # buffer init then EMA of itself == w
    else:
        new_weight = beta * prev_weight.astype(jnp.float32) + (1.0 - beta) * w

    out = loss / new_weight[None, :]
    return out, new_weight


def _ref(x, y, mask, prev_weight, beta):
    """Pure-JAX reference of the PyTorch forward."""
    logits = jnp.transpose(x, (0, 2, 1))                      # (N, L, C)
    lse = jax.nn.logsumexp(logits, axis=-1)
    tgt = jnp.take_along_axis(logits, y[..., None], axis=-1)[..., 0]
    loss = lse - tgt
    w = (loss * mask).sum(0) / mask.sum(0)
    w = w / jnp.sort(w)[(w.shape[0] - 1) // 2]
    weight = w if prev_weight is None else beta * prev_weight + (1.0 - beta) * w
    return loss / weight, weight


if __name__ == "__main__":
    N, C, L = 2, 32, 8           # batch, num classes (vocab), sequence length
    beta = 0.999
    key = jax.random.PRNGKey(0)
    kx, ky, km, kx2, ky2 = jax.random.split(key, 5)

    x = jax.random.normal(kx, (N, C, L), jnp.float32)         # PyTorch-style (N, C, L)
    y = jax.random.randint(ky, (N, L), 0, C)
    mask = (jax.random.uniform(km, (N, L)) > 0.3).astype(jnp.float32)
    mask = mask.at[0].set(1.0)   # every position has >= 1 valid token (no /0)

    # First call: no running weight buffer yet (register_buffer path).
    out1, w1 = seq_weighted_loss(x, y, mask, prev_weight=None, beta=beta)
    jax.block_until_ready((out1, w1))
    ref_out1, ref_w1 = _ref(x, y, mask, None, beta)
    assert jnp.allclose(out1, ref_out1, atol=1e-4, rtol=1e-4)
    assert jnp.allclose(w1, ref_w1, atol=1e-4, rtol=1e-4)

    # Second call: EMA update of the running per-position weight buffer.
    x2 = jax.random.normal(kx2, (N, C, L), jnp.float32)
    y2 = jax.random.randint(ky2, (N, L), 0, C)
    out2, w2 = seq_weighted_loss(x2, y2, mask, prev_weight=w1, beta=beta)
    jax.block_until_ready((out2, w2))
    ref_out2, ref_w2 = _ref(x2, y2, mask, ref_w1, beta)
    assert jnp.allclose(out2, ref_out2, atol=1e-4, rtol=1e-4)
    assert jnp.allclose(w2, ref_w2, atol=1e-4, rtol=1e-4)

    print("KERNEL_OK")
</pallas_src>

<mosaic_0001>
module attributes {stable_mosaic.version = 11 : i64} {
  func.func @_xent_wraw_kernel(%arg0: i32, %arg1: i32, %arg2: memref<1x32x8xf32, #tpu.memory_space<vmem>>, %arg3: memref<1x1x8xi32, #tpu.memory_space<vmem>>, %arg4: memref<1x1x8xf32, #tpu.memory_space<vmem>>, %arg5: memref<1x1x8xf32, #tpu.memory_space<vmem>>, %arg6: memref<1x1x8xf32, #tpu.memory_space<vmem>>, %arg7: memref<1x1x8xf32, #tpu.memory_space<vmem>>) attributes {dimension_semantics = [#tpu.dimension_semantics<parallel>, #tpu.dimension_semantics<arbitrary>], iteration_bounds = array<i64: 1, 2>, scalar_prefetch = 0 : i64, scratch_operands = 0 : i64, tpu.core_type = #tpu.core_type<tc>, window_params = [{transform_indices = @transform_0, window_bounds = array<i64: 1, 32, 8>}, {transform_indices = @transform_1, window_bounds = array<i64: 1, 1, 8>}, {transform_indices = @transform_2, window_bounds = array<i64: 1, 1, 8>}, {transform_indices = @transform_3, window_bounds = array<i64: 1, 1, 8>}, {transform_indices = @transform_4, window_bounds = array<i64: 1, 1, 8>}, {transform_indices = @transform_5, window_bounds = array<i64: 1, 1, 8>}]} {
    %c0 = arith.constant 0 : index
    %c0_0 = arith.constant 0 : index
    %c0_1 = arith.constant 0 : index
    %0 = vector.load %arg2[%c0, %c0_0, %c0_1] : memref<1x32x8xf32, #tpu.memory_space<vmem>>, vector<1x32x8xf32>
    %1 = vector.shape_cast %0 : vector<1x32x8xf32> to vector<32x8xf32>
    %c0_2 = arith.constant 0 : index
    %c0_3 = arith.constant 0 : index
    %c0_4 = arith.constant 0 : index
    %2 = vector.load %arg3[%c0_2, %c0_3, %c0_4] : memref<1x1x8xi32, #tpu.memory_space<vmem>>, vector<1x1x8xi32>
    %3 = vector.shape_cast %2 : vector<1x1x8xi32> to vector<1x8xi32>
    %c0_5 = arith.constant 0 : index
    %c0_6 = arith.constant 0 : index
    %c0_7 = arith.constant 0 : index
    %4 = vector.load %arg4[%c0_5, %c0_6, %c0_7] : memref<1x1x8xf32, #tpu.memory_space<vmem>>, vector<1x1x8xf32>
    %5 = vector.shape_cast %4 : vector<1x1x8xf32> to vector<1x8xf32>
    %cst = arith.constant dense<0xFF800000> : vector<8xf32>
    %6 = vector.multi_reduction <maximumf>, %1, %cst [0] : vector<32x8xf32> to vector<8xf32>
    %7 = vector.shape_cast %6 : vector<8xf32> to vector<1x8xf32>
    %8 = vector.broadcast %7 : vector<1x8xf32> to vector<32x8xf32>
    %9 = arith.subf %1, %8 : vector<32x8xf32>
    %10 = math.exp %9 : vector<32x8xf32>
    %cst_8 = arith.constant dense<0.000000e+00> : vector<8xf32>
    %11 = vector.multi_reduction <add>, %10, %cst_8 [0] : vector<32x8xf32> to vector<8xf32>
    %12 = vector.shape_cast %11 : vector<8xf32> to vector<1x8xf32>
    %13 = math.log %12 : vector<1x8xf32>
    %14 = arith.addf %13, %7 : vector<1x8xf32>
    %15 = tpu.iota {dimensions = array<i32: 0>} : vector<32x8xi32>
    %16 = vector.broadcast %3 : vector<1x8xi32> to vector<32x8xi32>
    %17 = arith.cmpi eq, %15, %16 : vector<32x8xi32>
    %cst_9 = arith.constant 0.000000e+00 : f32
    %18 = vector.broadcast %cst_9 : f32 to vector<32x8xf32>
    %19 = arith.select %17, %1, %18 : vector<32x8xi1>, vector<32x8xf32>
    %cst_10 = arith.constant dense<0.000000e+00> : vector<8xf32>
    %20 = vector.multi_reduction <add>, %19, %cst_10 [0] : vector<32x8xf32> to vector<8xf32>
    %21 = vector.shape_cast %20 : vector<8xf32> to vector<1x8xf32>
    %22 = arith.subf %14, %21 : vector<1x8xf32>
    %c0_11 = arith.constant 0 : index
    %c0_12 = arith.constant 0 : index
    %c0_13 = arith.constant 0 : index
    %23 = vector.load %arg5[%c0_11, %c0_12, %c0_13] : memref<1x1x8xf32, #tpu.memory_space<vmem>>, vector<1x1x8xf32>
    %24 = vector.shape_cast %23 : vector<1x1x8xf32> to vector<1x8xf32>
    %25 = vector.shape_cast %22 : vector<1x8xf32> to vector<1x1x8xf32>
    tpu.vector_store %arg5[%c0_11, %c0_12, %c0_13], %25 {strides = array<i32>} : memref<1x1x8xf32, #tpu.memory_space<vmem>>, vector<1x1x8xf32>,
    %c0_i32 = arith.constant 0 : i32
    %26 = arith.cmpi eq, %arg1, %c0_i32 : i32
    %27 = arith.extui %26 : i1 to i32
    %c0_i32_14 = arith.constant 0 : i32
    %28 = arith.cmpi ne, %27, %c0_i32_14 : i32
    scf.if %28 {
      %cst_27 = arith.constant 0.000000e+00 : f32
      %42 = vector.broadcast %cst_27 : f32 to vector<1x1x8xf32>
      %c0_28 = arith.constant 0 : index
      %c0_29 = arith.constant 0 : index
      %c0_30 = arith.constant 0 : index
      %43 = vector.load %arg6[%c0_28, %c0_29, %c0_30] : memref<1x1x8xf32, #tpu.memory_space<vmem>>, vector<1x1x8xf32>
      tpu.vector_store %arg6[%c0_28, %c0_29, %c0_30], %42 {strides = array<i32>} : memref<1x1x8xf32, #tpu.memory_space<vmem>>, vector<1x1x8xf32>,
      %cst_31 = arith.constant 0.000000e+00 : f32
      %44 = vector.broadcast %cst_31 : f32 to vector<1x1x8xf32>
      %c0_32 = arith.constant 0 : index
      %c0_33 = arith.constant 0 : index
      %c0_34 = arith.constant 0 : index
      %45 = vector.load %arg7[%c0_32, %c0_33, %c0_34] : memref<1x1x8xf32, #tpu.memory_space<vmem>>, vector<1x1x8xf32>
      tpu.vector_store %arg7[%c0_32, %c0_33, %c0_34], %44 {strides = array<i32>} : memref<1x1x8xf32, #tpu.memory_space<vmem>>, vector<1x1x8xf32>,
    } else {
    }
    %c0_15 = arith.constant 0 : index
    %c0_16 = arith.constant 0 : index
    %c0_17 = arith.constant 0 : index
    %29 = vector.load %arg6[%c0_15, %c0_16, %c0_17] : memref<1x1x8xf32, #tpu.memory_space<vmem>>, vector<1x1x8xf32>
    %30 = vector.shape_cast %29 : vector<1x1x8xf32> to vector<1x8xf32>
    %31 = arith.mulf %22, %5 : vector<1x8xf32>
    %32 = arith.addf %30, %31 : vector<1x8xf32>
    %c0_18 = arith.constant 0 : index
    %c0_19 = arith.constant 0 : index
    %c0_20 = arith.constant 0 : index
    %33 = vector.load %arg6[%c0_18, %c0_19, %c0_20] : memref<1x1x8xf32, #tpu.memory_space<vmem>>, vector<1x1x8xf32>
    %34 = vector.shape_cast %33 : vector<1x1x8xf32> to vector<1x8xf32>
    %35 = vector.shape_cast %32 : vector<1x8xf32> to vector<1x1x8xf32>
    tpu.vector_store %arg6[%c0_18, %c0_19, %c0_20], %35 {strides = array<i32>} : memref<1x1x8xf32, #tpu.memory_space<vmem>>, vector<1x1x8xf32>,
    %c0_21 = arith.constant 0 : index
    %c0_22 = arith.constant 0 : index
    %c0_23 = arith.constant 0 : index
    %36 = vector.load %arg7[%c0_21, %c0_22, %c0_23] : memref<1x1x8xf32, #tpu.memory_space<vmem>>, vector<1x1x8xf32>
    %37 = vector.shape_cast %36 : vector<1x1x8xf32> to vector<1x8xf32>
    %38 = arith.addf %37, %5 : vector<1x8xf32>
    %c0_24 = arith.constant 0 : index
    %c0_25 = arith.constant 0 : index
    %c0_26 = arith.constant 0 : index
    %39 = vector.load %arg7[%c0_24, %c0_25, %c0_26] : memref<1x1x8xf32, #tpu.memory_space<vmem>>, vector<1x1x8xf32>
    %40 = vector.shape_cast %39 : vector<1x1x8xf32> to vector<1x8xf32>
    %41 = vector.shape_cast %38 : vector<1x8xf32> to vector<1x1x8xf32>
    tpu.vector_store %arg7[%c0_24, %c0_25, %c0_26], %41 {strides = array<i32>} : memref<1x1x8xf32, #tpu.memory_space<vmem>>, vector<1x1x8xf32>,
    return
  }
  func.func @transform_0(%arg0: i32, %arg1: i32) -> (i32, i32, i32) {
    %c0_i32 = arith.constant 0 : i32
    %c0_i32_0 = arith.constant 0 : i32
    return %arg1, %c0_i32, %arg0 : i32, i32, i32
  }
  func.func @transform_1(%arg0: i32, %arg1: i32) -> (i32, i32, i32) {
    %c0_i32 = arith.constant 0 : i32
    %c0_i32_0 = arith.constant 0 : i32
    return %arg1, %c0_i32, %arg0 : i32, i32, i32
  }
  func.func @transform_2(%arg0: i32, %arg1: i32) -> (i32, i32, i32) {
    %c0_i32 = arith.constant 0 : i32
    %c0_i32_0 = arith.constant 0 : i32
    return %arg1, %c0_i32, %arg0 : i32, i32, i32
  }
  func.func @transform_3(%arg0: i32, %arg1: i32) -> (i32, i32, i32) {
    %c0_i32 = arith.constant 0 : i32
    %c0_i32_0 = arith.constant 0 : i32
    return %arg1, %c0_i32, %arg0 : i32, i32, i32
  }
  func.func @transform_4(%arg0: i32, %arg1: i32) -> (i32, i32, i32) {
    %c0_i32 = arith.constant 0 : i32
    %c0_i32_0 = arith.constant 0 : i32
    %c0_i32_1 = arith.constant 0 : i32
    return %c0_i32, %c0_i32_0, %arg0 : i32, i32, i32
  }
  func.func @transform_5(%arg0: i32, %arg1: i32) -> (i32, i32, i32) {
    %c0_i32 = arith.constant 0 : i32
    %c0_i32_0 = arith.constant 0 : i32
    %c0_i32_1 = arith.constant 0 : i32
    return %c0_i32, %c0_i32_0, %arg0 : i32, i32, i32
  }
}

</mosaic_0001>

<bundles_post_ra>
// kernel: tpu_custom_call.1
= control target key start
LH: loop header
LB: loop body
LE: loop exit
PB: predicated region body
PF: predicated region fallthrough
CT: control target
= control target key end

     0   :  { %11 = vsyncpa [#allocation3], 0  ;;  %s989_s0 = inlined_call_operand.vmem [shape: f32[2,32,8], index: 0, kind: input, shape index: {}]   ;;  %s990_s1 = inlined_call_operand.vmem [shape: s32[2,1,8], index: 1, kind: input, shape index: {}]   ;;  %s991_s2 = inlined_call_operand.vmem [shape: f32[2,1,8], index: 2, kind: input, shape index: {}]   ;;  %s992_s3 = inlined_call_operand.hbm [shape: f32[2,1,8], index: 3, kind: output, shape index: {0}]   ;;  %s993_s4 = inlined_call_operand.hbm [shape: f32[1,1,8], index: 4, kind: output, shape index: {1}]   ;;  %s994_s5 = inlined_call_operand.hbm [shape: f32[1,1,8], index: 5, kind: output, shape index: {2}]  }
   0x1   :  { %13 = vsyncpa [#allocation3 + $0x1], 0 }
   0x2   :  { %14 = vsyncpa [#allocation5], 0  ;;  %s817_s18 = smov 0   ;;  %s819_s19 = smov 0  }
   0x3   :  { %s821_s20 = smov 0   ;;  %s823_s21 = smov 0  }
   0x4   :  { %s825_s22 = smov 0   ;;  %s827_s23 = smov 0  }
   0x5 LB: > { %s556_s24 = sadd.s32 4294967295, %s781_s23   ;;  %s557_s25 = sadd.s32 4294967294, %s781_s23   ;;  %s781_s23 = sphi %s827_s23, %s20_s23   ;;  %s777_s22 = sphi %s825_s22, %s1002_s22   ;;  %s773_s21 = sphi %s823_s21, %s1001_s21   ;;  %s769_s20 = sphi %s821_s20, %s1000_s20   ;;  %s765_s19 = sphi %s819_s19, %s999_s19   ;;  %s761_s18 = sphi %s817_s18, %s998_s18  }
   0x6   : > { %s29_s26 = sadd.s32 1, %s777_s22  ;;  %s125_s27 = sadd.s32 1, %s769_s20 }
   0x7   : > { %p30_p0 = scmp.ge.s32.totalorder %s29_s26, 2  ;;  %p135_p1 = scmp.ne.s32.totalorder %s769_s20, %s765_s19 }
   0x8   : > { %p853_p2 = scmp.eq.s32.totalorder %s556_s24, 1  ;;  %p141_p3 = scmp.ne.s32.totalorder %s765_s19, %s761_s18 }
   0x9   : > { %s1004_s26 = smov (%p30_p0, %s29_s26), 0  ;;  %p142_p5 = scmp.eq.s32.totalorder %s557_s25, 1 }
   0xa   : > { %p863_p4 = por %p853_p2, %p135_p1  ;;  %s120_s30 = ssub.s32 %s777_s22, %s1004_s26 }
   0xb   : > { %p560_p6 = scmp.ge.s32.totalorder %s781_s23, 1  ;;  %p123_p7 = scmp.eq.s32.totalorder %s120_s30, 0 }
   0xc   : > { %p870_p8 = por %p142_p5, %p141_p3  ;;  %p241_p9 = scmp.lt.s32.totalorder %s781_s23, 3 }
   0xd   : > { %s876_s7 = scalar_select %p123_p7, %s769_s20, %s125_s27  }
   0xe   : > { %p242_p10 = pnand %p560_p6, %p241_p9 }
   0xf   : > { %p283_p11 = scmp.lt.s32.totalorder (!%p242_p10), %s773_s21, 1  ;;  %s277_s25 = sand.u32 (!%p242_p10), 1, %s765_s19  }
  0x10   : > { %245 = sbr.rel (%p242_p10) target bundleno = 155 (0x9b), region = 32  ;;  %s278_s27 = scalar_lea.vmem (!%p242_p10), [#allocation2], %s277_s25 }
  0x11   : > { %p564_p12 = scmp.ne.s32.totalorder (!%p242_p10), %s773_s21, 0 }
  0x15   : > { %s880_s8 = scalar_select %p283_p11, %s773_s21, 1  ;;  %vm309_vm0 = vcmask 64512   ;;  %v351_v18 = vlaneseq  ;;  %vm382_vm5 = vcmask 57344  }
  0x17   : > { %s572_s9 = sshll.u32 %s880_s8, 5  ;;  %s302_s15 = scalar_lea.vmem %s991_s2, %s880_s8  ;;  %v352_v27 = vshrl.u32 %v351_v18, 7 }
  0x18   : > { %s290_s12 = scalar_lea.vmem %s989_s0, %s572_s9  ;;  %v890_v4 = vld [vmem:[%s302_s15] sm:$0x1]  ;;  %s296_s24 = scalar_lea.vmem %s990_s1, %s880_s8 }
  0x19   : > { %v303_v0 = vld [vmem:[%s290_s12] sm:$0xff]  ;;  %v304_v1 = vld [vmem:[%s290_s12 + $0x8] sm:$0xff]  ;;  %v305_v2 = vld [vmem:[%s290_s12 + $0x10] sm:$0xff]  ;;  %v353_v28 = vadd.s32 8, %v352_v27  ;;  %v354_v30 = vadd.s32 16, %v352_v27  ;;  %v355_v33 = vadd.s32 24, %v352_v27 }
  0x1a   : > { %v306_v3 = vld [vmem:[%s290_s12 + $0x18] sm:$0xff]  ;;  %v310_v5 = vsel %vm309_vm0, %v303_v0, -inf  ;;  %v311_v6 = vsel %vm309_vm0, %v304_v1, -inf  ;;  %v312_v7 = vsel %vm309_vm0, %v305_v2, -inf  ;;  %v563_v29 = vld [vmem:[%s296_s24] ss:$0 sm:$0xff] }
  0x1b   : > { %v313_v8 = vsel %vm309_vm0, %v306_v3, -inf  ;;  %v314_v9 = vmax.f32 %v310_v5, %v311_v6  ;;  %vm360_vm1 = vcmp.eq.s32.totalorder %v352_v27, %v563_v29  ;;  %vm361_vm2 = vcmp.eq.s32.totalorder %v353_v28, %v563_v29 }
  0x1c   : > { %v315_v10 = vmax.f32 %v312_v7, %v313_v8  ;;  %v364_v31 = vsel %vm360_vm1, %v303_v0, 0.0  ;;  %v365_v32 = vsel %vm361_vm2, %v304_v1, 0.0  ;;  %vm362_vm3 = vcmp.eq.s32.totalorder %v354_v30, %v563_v29 }
  0x1d   : > { %v368_v35 = vsel %vm309_vm0, %v364_v31, 0.0  ;;  %v369_v36 = vsel %vm309_vm0, %v365_v32, 0.0  ;;  %v366_v39 = vsel %vm362_vm3, %v305_v2, 0.0  ;;  %vm363_vm4 = vcmp.eq.s32.totalorder %v355_v33, %v563_v29 }
  0x1e   : > { %v316_v11 = vmax.f32 %v314_v9, %v315_v10  ;;  %v370_v45 = vadd.f32 %v369_v36, %v368_v35  ;;  %v371_v47 = vsel %vm309_vm0, %v366_v39, 0.0  ;;  %v367_v49 = vsel %vm363_vm4, %v306_v3, 0.0 }
  0x1f   : > { %v373_v52 = vsel %vm309_vm0, %v367_v49, 0.0 }
  0x20   : > { %v317_v12 = vrot.slane %v316_v11, 4  ;;  %v372_v51 = vadd.f32 %v371_v47, %v370_v45 }
  0x22   : > { %v318_v13 = vmax.f32 %v316_v11, %v317_v12  ;;  %v374_v55 = vadd.f32 %v373_v52, %v372_v51 }
  0x24   : > { %v319_v14 = vrot.slane %v318_v13, 2  ;;  %v375_v58 = vrot.slane %v374_v55, 4 }
  0x26   : > { %v320_v15 = vmax.f32 %v318_v13, %v319_v14  ;;  %v376_v61 = vadd.f32 %v375_v58, %v374_v55 }
  0x28   : > { %v321_v16 = vrot.slane %v320_v15, 1  ;;  %v377_v62 = vrot.slane %v376_v61, 2 }
  0x2a   : > { %v322_v17 = vmax.f32 %v320_v15, %v321_v16  ;;  %v378_v63 = vadd.f32 %v377_v62, %v376_v61 }
  0x2c   : > { %v323_v19 = vsub.f32 %v303_v0, %v322_v17  ;;  %v324_v20 = vsub.f32 %v304_v1, %v322_v17  ;;  %v325_v21 = vsub.f32 %v305_v2, %v322_v17  ;;  %v326_v22 = vsub.f32 %v306_v3, %v322_v17 }
  0x2d   : > { %v379_v0 = vrot.slane %v378_v63, 1 }
  0x2e   : > { %v327_v23 = vmul.f32 1.442695, %v323_v19  ;;  %v329_v24 = vmul.f32 1.442695, %v324_v20  ;;  %v331_v25 = vmul.f32 1.442695, %v325_v21 }
  0x2f   : > { %v333_v26 = vmul.f32 1.442695, %v326_v22  ;;  %v380_v3 = vadd.f32 %v379_v0, %v378_v63 }
  0x30   : > { %643 = vpow2.f32 %v327_v23 }
  0x31   : > { %645 = vpow2.f32 %v329_v24 }
  0x32   : > { %647 = vpow2.f32 %v331_v25 }
  0x33   : > { %649 = vpow2.f32 %v333_v26 }
  0x3d   : > { %v644_v34 = vpop.eup %643 }
  0x3e   : > { %v646_v37 = vpop.eup %645  ;;  %v335_v38 = vsel %vm309_vm0, %v644_v34, 0.0 }
  0x3f   : > { %v648_v40 = vpop.eup %647  ;;  %v336_v41 = vsel %vm309_vm0, %v646_v37, 0.0 }
  0x40   : > { %v650_v42 = vpop.eup %649  ;;  %v337_v43 = vadd.f32 %v336_v41, %v335_v38  ;;  %v338_v44 = vsel %vm309_vm0, %v648_v40, 0.0 }
  0x41   : > { %v340_v46 = vsel %vm309_vm0, %v650_v42, 0.0 }
  0x42   : > { %v339_v48 = vadd.f32 %v338_v44, %v337_v43 }
  0x44   : > { %v341_v50 = vadd.f32 %v340_v46, %v339_v48 }
  0x46   : > { %v342_v53 = vrot.slane %v341_v50, 4 }
  0x48   : > { %v343_v54 = vadd.f32 %v342_v53, %v341_v50 }
  0x4a   : > { %v344_v56 = vrot.slane %v343_v54, 2 }
  0x4c   : > { %v345_v57 = vadd.f32 %v344_v56, %v343_v54 }
  0x4e   : > { %v346_v59 = vrot.slane %v345_v57, 1 }
  0x50   : > { %v347_v60 = vadd.f32 %v346_v59, %v345_v57 }
  0x52   : > { %651 = vlog2.f32 %v347_v60 }
  0x5f   : > { %v652_v1 = vpop.eup %651 }
  0x60   : > { %v349_v2 = vmul.f32 0.6931472, %v652_v1 }
  0x62   : > { %v350_v5 = vadd.f32 %v349_v2, %v322_v17  ;;  %387 = sbr.rel (%p564_p12) target bundleno = 105 (0x69), region = 36 }
  0x64   : > { %v381_v6 = vsub.f32 %v350_v5, %v380_v3 }
  0x66   : > { %383 = vst.msk [vmem:[%s278_s27] sm:$0x1] %vm382_vm5, %v381_v6 }
  0x67   : > { %v783_v7 = vmov 0.0  }
  0x68   : > { %388 = vst.msk [vmem:[#allocation4] sm:$0x1] %vm382_vm5, %v783_v7  ;;  %389 = vst.msk [vmem:[#allocation6] sm:$0x1] %vm382_vm5, %v783_v7 }
  0x69 PF: > { %v391_v9 = vmul.f32 %v381_v6, %v890_v4  ;;  %s784_s30 = smov [#allocation4]   ;;  %s565_s9 = sshll.u32 %s773_s21, 4 }
  0x6a   : > { %s424_s8 = sshll.u32 %s784_s30, 4  ;;  %s922_s12 = scalar_lea.hbm %s992_s3, %s565_s9  ;;  %s425_s8 = int_to_ptr.vmem [resolvable:$true] %s424_s8 }
  0x6b   : > { %s411_s13 = sshll.u32 %s278_s27, 4  ;;  %s653_s14 = scalar_lea.vmem %s425_s8, 16  ;;  %s925_s13 = int_to_ptr.vmem [resolvable:$true] %s411_s13 }
  0x6c   : > { %p654_p13 = scmp.ne.s32.totalorder %s425_s8, %s653_s14  ;;  %s659_s15 = scalar_lea.vmem %s425_s8, 32 }
  0x6d   : > { %p660_p3 = scmp.lt.s32.totalorder %s425_s8, %s425_s8  ;;  %p661_p5 = scmp.lt.s32.totalorder %s659_s15, %s653_s14 }
  0x6e   : > { %p655_p0 = pnand %p654_p13, %p853_p2 }
  0x6f   : > { %v390_v8 = vld [vmem:[#allocation4] sm:$0x1]  ;;  %v394_v10 = vld [vmem:[#allocation6] sm:$0x1]  ;;  %p662_p6 = por %p661_p5, %p660_p3 }
  0x70   : > { %v395_v11 = vadd.f32 %v394_v10, %v890_v4  ;;  %v392_v12 = vadd.f32 %v391_v9, %v390_v8  ;;  %p656_p1 = pneg %p655_p0 }
  0x72   : > { %396 = vst.msk [vmem:[#allocation6] sm:$0x1] %vm382_vm5, %v395_v11  ;;  %393 = vst.msk [vmem:[#allocation4] sm:$0x1] %vm382_vm5, %v392_v12  ;;  %p663_p7 = pnand %p662_p6, %p656_p1 }
  0x74   : > { %666 = shalt.err (!%p663_p7)
}
  0x75   : > { %575 = dma.vmem_to_hbm [thread:$0]  (%p853_p2), %s425_s8, 16, %s993_s4, [#allocation5]  }
  0x76   : > { %s398_s17 = scalar_lea.sflag [#allocation3], %s277_s25  ;;  %s677_s24 = scalar_lea.vmem %s925_s13, 16 }
  0x77   : > { %p678_p9 = scmp.ne.s32.totalorder %s925_s13, %s677_s24  ;;  %s785_s27 = smov [#allocation2]  }
  0x78   : > { %s681_s30 = sshll.u32 %s785_s27, 4  ;;  %s682_s30 = int_to_ptr.vmem [resolvable:$false] %s681_s30 }
  0x79   : > { %p679_p10 = pnand %p678_p9, %p863_p4  ;;  %s683_s9 = scalar_lea.vmem %s682_s30, 32 }
  0x7a   : > { %p684_p12 = scmp.lt.s32.totalorder %s925_s13, %s682_s30  ;;  %p685_p13 = scmp.lt.s32.totalorder %s683_s9, %s677_s24 }
  0x7b   : > { %p680_p11 = pneg %p679_p10 }
  0x7c   : > { %p686_p0 = por %p685_p13, %p684_p12 }
  0x7e   : > { %p687_p1 = pnand %p686_p0, %p680_p11 }
  0x80   : > { %690 = shalt.err (!%p687_p1)
}
  0x81   : > { %s691_s8 = scalar_lea.hbm %s922_s12, 16  ;;  %s695_s11 = scalar_lea.hbm %s992_s3, 32 }
  0x82   : > { %p692_p3 = scmp.ne.s32.totalorder %s922_s12, %s691_s8  ;;  %p696_p7 = scmp.lt.s32.totalorder %s922_s12, %s992_s3 }
  0x83   : > { %p697_p9 = scmp.lt.s32.totalorder %s695_s11, %s691_s8 }
  0x84   : > { %p693_p5 = pnand %p692_p3, %p863_p4 }
  0x85   : > { %p698_p10 = por %p697_p9, %p696_p7 }
  0x86   : > { %p694_p6 = pneg %p693_p5 }
  0x88   : > { %p699_p11 = pnand %p698_p10, %p694_p6 }
  0x8a   : > { %702 = shalt.err (!%p699_p11)
}
  0x8b   : > { %573 = dma.vmem_to_hbm [thread:$0]  (%p863_p4), %s925_s13, 16, %s922_s12, %s398_s17  }
  0x8c   : > { %s786_s21 = smov [#allocation6]  }
  0x8d   : > { %s437_s16 = sshll.u32 %s786_s21, 4  ;;  %s438_s16 = int_to_ptr.vmem [resolvable:$true] %s437_s16 }
  0x8e   : > { %s703_s24 = scalar_lea.vmem %s438_s16, 16  ;;  %s709_s27 = scalar_lea.vmem %s438_s16, 32 }
  0x8f   : > { %p704_p12 = scmp.ne.s32.totalorder %s438_s16, %s703_s24  ;;  %p710_p1 = scmp.lt.s32.totalorder %s438_s16, %s438_s16 }
  0x90   : > { %p711_p3 = scmp.lt.s32.totalorder %s709_s27, %s703_s24 }
  0x91   : > { %p705_p13 = pnand %p704_p12, %p853_p2 }
  0x92   : > { %p712_p5 = por %p711_p3, %p710_p1 }
  0x93   : > { %p706_p0 = pneg %p705_p13 }
  0x95   : > { %p713_p6 = pnand %p712_p5, %p706_p0 }
  0x97   : > { %716 = shalt.err (!%p713_p6)
}
  0x98   : > { %577 = dma.vmem_to_hbm [thread:$0]  (%p853_p2), %s438_s16, 16, %s994_s5, [#allocation5]  }
  0x99   : > { %752 = dma.done.wait (%p853_p2), [#allocation5], 32  }
  0x9a   : > { %754 = vsyncadd (%p853_p2), [#allocation5], 4294967264 }
  0x9b PF: > { %p591_p4 = scmp.ge.s32.totalorder %s781_s23, 2  ;;  %s457_s12 = sand.u32 1, %s761_s18  }
  0x9c   : > { %s458_s13 = scalar_lea.sflag [#allocation3], %s457_s12 }
  0x9d   : > { %p584_p7 = pnand %p591_p4, %p870_p8 }
  0x9f   : > { %p585_p9 = pneg %p584_p7 }
  0xa1   : > { %756 = dma.done.wait (%p585_p9), %s458_s13, 16  }
  0xa2   : > { %758 = vsyncadd (%p585_p9), %s458_s13, 4294967280  ;;  %s20_s23 = sadd.s32 1, %s781_s23   ;;  %s998_s18 = smov %s765_s19 }
  0xa3   : > { %p17_p10 = scmp.ge.s32.totalorder %s20_s23, 4   ;;  %s999_s19 = smov %s769_s20 }
  0xa4   : > { %s1000_s20 = smov %s876_s7  ;;  %s1001_s21 = smov %s777_s22 }
  0xa5   : > { %s1002_s22 = smov %s1004_s26  ;;  %19 = sbr.rel (!%p17_p10) target bundleno = 5 (0x5), region = 95 }
  0xaa   :  { %462 = vsyncpa [#allocation3], 1 }
  0xab   :  { %464 = vsyncpa [#allocation3 + $0x1], 1 }
  0xac   :  { %465 = vsyncpa [#allocation5], 1 }

</bundles_post_ra>
